<compile_context>
chip_gen: v5e
topology: v5e:2x2
jax: 0.10.0
libtpu: 0.0.40
codegen_flags: <defaults>
</compile_context>

<pallas_src>
import functools
import math

import jax
import jax.numpy as jnp
from jax import lax
from jax.experimental import pallas as pl
from jax.experimental.pallas import tpu as pltpu


def _round_up(x, m):
    return (x + m - 1) // m * m


def _num_tensorcores():
    """Conservative per-chip TensorCore count from the device kind string."""
    try:
        kind = jax.devices()[0].device_kind.lower()
    except Exception:  # pragma: no cover - non-TPU fallback
        return 1
    if "lite" in kind or "v5e" in kind or "v6e" in kind:
        return 1                      # v5e / v6e: one TensorCore per chip
    if "v7" in kind or "7x" in kind or "v4" in kind or "v5p" in kind or "v5" in kind:
        return 2                      # v7x (2 TCs) and megacore v4/v5p
    return 1


# ---------------------------------------------------------------------------
# Fused stacked-conv kernel.
# Layout: activations are 2-D (rows, lanes) slabs where rows = images stacked
# along the sublane axis (blk images * H rows each) and lanes = W*C padded to a
# multiple of 128.  Each layer is one matmul against a row-banded
# (block-Toeplitz over width) weight with the KH row taps folded into K.
# ---------------------------------------------------------------------------
def _make_stacked_kernel(num_layers, blk, kh_taps, layer_dims, compute_dtype,
                         has_bias):
    """layer_dims: tuple of (h_in, oh, lanes_in, lanes_out) per layer."""

    def kernel(*refs):
        x_ref = refs[0]                              # (blk*H0, lanes0)
        w_refs = refs[1:1 + num_layers]              # (KH*lanes_in, lanes_out) each
        pos = 1 + num_layers
        b_ref = None
        if has_bias:
            b_ref = refs[pos]                        # (1, lanes_last) f32
            pos += 1
        o_ref = refs[pos]                            # (blk*OH_last, lanes_last)
        lhs_ref = refs[pos + 1]                      # VMEM scratch (M_max, K_max)

        act = None
        for l in range(num_layers):                  # static unroll over layers
            h_in, oh, lanes_in, lanes_out = layer_dims[l]
            src = x_ref if l == 0 else act
            # im2row: the KH shifted row windows of every image, concatenated on
            # lanes, so one matmul gets M = blk*OH and K = KH*lanes_in.
            for b in range(blk):                     # static unroll, blk is small
                base = b * h_in
                for t in range(kh_taps):
                    lhs_ref[b * oh:(b + 1) * oh,
                            t * lanes_in:(t + 1) * lanes_in] = (
                                src[base + t:base + t + oh, :])
            res = jnp.dot(lhs_ref[0:blk * oh, 0:kh_taps * lanes_in],
                          w_refs[l][...],
                          preferred_element_type=jnp.float32)
            if l + 1 < num_layers:
                act = res.astype(compute_dtype)      # stays on-chip (no HBM)
            else:
                if has_bias:
                    res = res + b_ref[...]           # broadcast over rows
                o_ref[...] = res.astype(o_ref.dtype)

    return kernel


# ---------------------------------------------------------------------------
# Wrapper-side weight plumbing (one-time per layer under jit).
# ---------------------------------------------------------------------------
def _banded_weight(w_oihw, in_width):
    """Expand an OIHW kernel into per-row-tap banded matmul weights.

    Returns (KH, in_width*Cin, OW*Cout) such that
      out_row[oh][ow*Cout+co] = sum_kh x_row[oh+kh] @ band[kh]
    with band[kh][(ow+kw)*Cin+ci, ow*Cout+co] = w[co, ci, kh, kw].
    """
    cout, cin, khs, kws = w_oihw.shape
    ow = in_width - kws + 1
    w_k = jnp.transpose(w_oihw, (2, 3, 1, 0))                # (KH, KW, Cin, Cout)
    u = jnp.arange(in_width)
    o = jnp.arange(ow)
    k = jnp.arange(kws)
    sel = (u[None, :, None] == o[None, None, :] + k[:, None, None]).astype(w_oihw.dtype)
    band = jnp.einsum("kuo,hkcd->hucod", sel, w_k)           # (KH, W, Cin, OW, Cout)
    return band.reshape(khs, in_width * cin, ow * cout)


def stacked_conv2d_forward(x_nchw, weights, last_bias=None, *, bf16_operands=False):
    """StackedConv2d forward (stride=1, padding=0, groups=1).

    x_nchw:   (N, Cin, H, W) float32 (PyTorch layout)
    weights:  list of OIHW sub-conv weights
    last_bias: optional (Cout,) bias on the final conv (module default: None)
    bf16_operands: bf16 matmul operands + bf16 inter-layer activations,
                   f32 accumulation (v6e/v7x MXU path).
    """
    n, cin, h, w = x_nchw.shape
    out_dtype = x_nchw.dtype
    compute_dtype = jnp.bfloat16 if bf16_operands else jnp.float32
    num_layers = len(weights)
    kh_taps = weights[0].shape[2]

    # Per-layer geometry and banded weights, lane-padded to multiples of 128.
    layer_dims = []
    wmats = []
    h_cur, w_cur, c_cur = h, w, cin
    lanes_in = _round_up(w_cur * c_cur, 128)
    lanes0 = lanes_in
    for w_l in weights:
        cout, cin_l, khs, kws = w_l.shape
        assert khs == kws == kh_taps, "sub-kernels must be square and identical"
        assert cin_l == c_cur, "channel mismatch in stacked conv (groups!=1 unsupported)"
        oh, ow = h_cur - khs + 1, w_cur - kws + 1
        lanes_out = _round_up(ow * cout, 128)
        band = _banded_weight(w_l, w_cur)                    # (KH, Wc*Cc, OW*Cout)
        band = jnp.pad(band, ((0, 0),
                              (0, lanes_in - w_cur * c_cur),
                              (0, lanes_out - ow * cout)))   # zero rows/cols keep pad lanes 0
        wmats.append(band.reshape(khs * lanes_in, lanes_out).astype(compute_dtype))
        layer_dims.append((h_cur, oh, lanes_in, lanes_out))
        h_cur, w_cur, c_cur = oh, ow, cout
        lanes_in = lanes_out
    layer_dims = tuple(layer_dims)
    oh_last = layer_dims[-1][1]
    lanes_last = layer_dims[-1][3]

    # Channels-last ONCE at the boundary, pad lanes, and stack images onto the
    # sublane axis so the kernel sees a lane-dense 2-D (rows, 128*k) slab.
    x_cl = jnp.transpose(x_nchw, (0, 2, 3, 1)).reshape(n, h, w * cin)
    x_cl = jnp.pad(x_cl, ((0, 0), (0, 0), (0, lanes0 - w * cin)))
    x2d = x_cl.reshape(n * h, lanes0).astype(compute_dtype)

    # Generation-aware grid: only split the batch when the chip has 2 TCs.
    blk, grid_n = n, 1
    if _num_tensorcores() >= 2 and n % 2 == 0 and n >= 2:
        cand = n // 2
        if (cand * h) % 8 == 0 and (cand * oh_last) % 8 == 0:
            blk, grid_n = cand, 2

    has_bias = last_bias is not None
    inputs = [x2d] + list(wmats)
    in_specs = [pl.BlockSpec((blk * h, lanes0), lambda i: (i, 0))]
    for wm in wmats:
        in_specs.append(pl.BlockSpec(wm.shape, lambda i: (0, 0)))
    if has_bias:
        ow_last, cout_last = w_cur, c_cur
        brow = jnp.pad(jnp.tile(last_bias.astype(jnp.float32), ow_last),
                       (0, lanes_last - ow_last * cout_last)).reshape(1, lanes_last)
        inputs.append(brow)
        in_specs.append(pl.BlockSpec((1, lanes_last), lambda i: (0, 0)))

    kernel = _make_stacked_kernel(num_layers, blk, kh_taps, layer_dims,
                                  compute_dtype, has_bias)

    max_m = max(blk * d[1] for d in layer_dims)
    max_k = max(kh_taps * d[2] for d in layer_dims)

    # Advisory cost + a VMEM budget derived from the actual working set.
    flops = int(sum(2 * n * d[1] * (kh_taps * d[2]) * d[3] for d in layer_dims))
    c_item = jnp.dtype(compute_dtype).itemsize
    o_item = jnp.dtype(out_dtype).itemsize
    bytes_accessed = int(x2d.size * c_item
                         + sum(wm.size * c_item for wm in wmats)
                         + n * oh_last * lanes_last * o_item)
    working = (2 * blk * h * lanes0 * c_item
               + 2 * blk * oh_last * lanes_last * o_item
               + 2 * sum(wm.size * c_item for wm in wmats)
               + max_m * max_k * c_item)
    vmem_limit = int(min(32 * 1024 * 1024, max(4 * 1024 * 1024, 4 * working)))

    out2d = pl.pallas_call(
        kernel,
        out_shape=jax.ShapeDtypeStruct((n * oh_last, lanes_last), out_dtype),
        grid=(grid_n,),
        in_specs=in_specs,
        out_specs=pl.BlockSpec((blk * oh_last, lanes_last), lambda i: (i, 0)),
        scratch_shapes=[pltpu.VMEM((max_m, max_k), compute_dtype)],
        compiler_params=pltpu.CompilerParams(
            dimension_semantics=("parallel",),
            vmem_limit_bytes=vmem_limit,
        ),
        cost_estimate=pl.CostEstimate(flops=flops, transcendentals=0,
                                      bytes_accessed=bytes_accessed),
    )(*inputs)

    # Slice off lane padding; the reshapes back to NHWC are metadata-only.
    out = out2d.reshape(n, oh_last, lanes_last)[..., :w_cur * c_cur]
    out = out.reshape(n, oh_last, w_cur, c_cur)
    return jnp.transpose(out, (0, 3, 1, 2))                  # back to NCHW once


def init_conv_weight(key, in_channels, out_channels, kernel_size):
    """Deterministic init mimicking nn.Conv2d's default (uniform +-1/sqrt(fan_in))."""
    fan_in = in_channels * kernel_size * kernel_size
    bound = 1.0 / math.sqrt(fan_in)
    return jax.random.uniform(
        key, (out_channels, in_channels, kernel_size, kernel_size),
        minval=-bound, maxval=bound, dtype=jnp.float32)


if __name__ == "__main__":
    key = jax.random.PRNGKey(0)

    # StackedConv2d(in_channels=4, out_channels=8, kernel_size=5,
    #               sub_kernel_size=3, padding=0, bias=False)
    N, Cin, H, W = 4, 4, 16, 16
    Cout, ksize, sub = 8, 5, 3
    num_layers = (ksize - sub) // (sub - 1) + 1              # == 2 stacked 3x3 convs

    key, k_x = jax.random.split(key)
    x = jax.random.normal(k_x, (N, Cin, H, W), dtype=jnp.float32)

    weights = []
    cin_l = Cin
    for _ in range(num_layers):
        key, k_l = jax.random.split(key)
        weights.append(init_conv_weight(k_l, cin_l, Cout, sub))
        cin_l = Cout

    # f32-operand path.
    fwd_f32 = jax.jit(functools.partial(stacked_conv2d_forward, bf16_operands=False))
    out = jax.block_until_ready(fwd_f32(x, weights))

    # Reference: the same stack via XLA convs (== nn.Conv2d defaults, bias=False).
    ref = x
    for w_l in weights:
        ref = lax.conv_general_dilated(
            ref, w_l, window_strides=(1, 1), padding="VALID",
            dimension_numbers=("NCHW", "OIHW", "NCHW"))
    ref = jax.block_until_ready(ref)

    out_hw = H - num_layers * (sub - 1)
    assert out.shape == (N, Cout, out_hw, out_hw), out.shape
    assert jnp.allclose(out, ref, atol=1e-4, rtol=1e-4)

    # bf16-operand MXU path (bf16 inter-layer activations, f32 accumulation).
    fwd_bf16 = jax.jit(functools.partial(stacked_conv2d_forward, bf16_operands=True))
    out_bf16 = jax.block_until_ready(fwd_bf16(x, weights))
    assert jnp.allclose(out_bf16, ref, atol=5e-2, rtol=5e-2)

    print("KERNEL_OK")
</pallas_src>

<mosaic_0001>
module attributes {stable_mosaic.version = 11 : i64} {
  func.func @kernel(%arg0: i32, %arg1: memref<64x128xf32, #tpu.memory_space<vmem>>, %arg2: memref<384x128xf32, #tpu.memory_space<vmem>>, %arg3: memref<384x128xf32, #tpu.memory_space<vmem>>, %arg4: memref<48x128xf32, #tpu.memory_space<vmem>>, %arg5: memref<56x384xf32, #tpu.memory_space<vmem>>) attributes {dimension_semantics = [#tpu.dimension_semantics<parallel>], iteration_bounds = array<i64: 1>, scalar_prefetch = 0 : i64, scratch_operands = 1 : i64, tpu.core_type = #tpu.core_type<tc>, window_params = [{transform_indices = @transform_0, window_bounds = array<i64: 64, 128>}, {pipeline_mode = #tpu.pipeline_mode<synchronous>, transform_indices = @transform_1, window_bounds = array<i64: 384, 128>}, {pipeline_mode = #tpu.pipeline_mode<synchronous>, transform_indices = @transform_2, window_bounds = array<i64: 384, 128>}, {transform_indices = @transform_3, window_bounds = array<i64: 48, 128>}]} {
    %c0 = arith.constant 0 : index
    %c0_0 = arith.constant 0 : index
    %0 = vector.load %arg1[%c0, %c0_0] : memref<64x128xf32, #tpu.memory_space<vmem>>, vector<14x128xf32>
    %c0_1 = arith.constant 0 : index
    %c0_2 = arith.constant 0 : index
    %1 = vector.load %arg5[%c0_1, %c0_2] : memref<56x384xf32, #tpu.memory_space<vmem>>, vector<14x128xf32>
    tpu.vector_store %arg5[%c0_1, %c0_2], %0 {strides = array<i32>} : memref<56x384xf32, #tpu.memory_space<vmem>>, vector<14x128xf32>,
    %c1 = arith.constant 1 : index
    %c0_3 = arith.constant 0 : index
    %2 = vector.load %arg1[%c1, %c0_3] : memref<64x128xf32, #tpu.memory_space<vmem>>, vector<14x128xf32>
    %c0_4 = arith.constant 0 : index
    %c128 = arith.constant 128 : index
    %3 = vector.load %arg5[%c0_4, %c128] : memref<56x384xf32, #tpu.memory_space<vmem>>, vector<14x128xf32>
    tpu.vector_store %arg5[%c0_4, %c128], %2 {strides = array<i32>} : memref<56x384xf32, #tpu.memory_space<vmem>>, vector<14x128xf32>,
    %c2 = arith.constant 2 : index
    %c0_5 = arith.constant 0 : index
    %4 = vector.load %arg1[%c2, %c0_5] : memref<64x128xf32, #tpu.memory_space<vmem>>, vector<14x128xf32>
    %c0_6 = arith.constant 0 : index
    %c256 = arith.constant 256 : index
    %5 = vector.load %arg5[%c0_6, %c256] : memref<56x384xf32, #tpu.memory_space<vmem>>, vector<14x128xf32>
    tpu.vector_store %arg5[%c0_6, %c256], %4 {strides = array<i32>} : memref<56x384xf32, #tpu.memory_space<vmem>>, vector<14x128xf32>,
    %c16 = arith.constant 16 : index
    %c0_7 = arith.constant 0 : index
    %6 = vector.load %arg1[%c16, %c0_7] : memref<64x128xf32, #tpu.memory_space<vmem>>, vector<14x128xf32>
    %c14 = arith.constant 14 : index
    %c0_8 = arith.constant 0 : index
    %7 = vector.load %arg5[%c14, %c0_8] : memref<56x384xf32, #tpu.memory_space<vmem>>, vector<14x128xf32>
    tpu.vector_store %arg5[%c14, %c0_8], %6 {strides = array<i32>} : memref<56x384xf32, #tpu.memory_space<vmem>>, vector<14x128xf32>,
    %c17 = arith.constant 17 : index
    %c0_9 = arith.constant 0 : index
    %8 = vector.load %arg1[%c17, %c0_9] : memref<64x128xf32, #tpu.memory_space<vmem>>, vector<14x128xf32>
    %c14_10 = arith.constant 14 : index
    %c128_11 = arith.constant 128 : index
    %9 = vector.load %arg5[%c14_10, %c128_11] : memref<56x384xf32, #tpu.memory_space<vmem>>, vector<14x128xf32>
    tpu.vector_store %arg5[%c14_10, %c128_11], %8 {strides = array<i32>} : memref<56x384xf32, #tpu.memory_space<vmem>>, vector<14x128xf32>,
    %c18 = arith.constant 18 : index
    %c0_12 = arith.constant 0 : index
    %10 = vector.load %arg1[%c18, %c0_12] : memref<64x128xf32, #tpu.memory_space<vmem>>, vector<14x128xf32>
    %c14_13 = arith.constant 14 : index
    %c256_14 = arith.constant 256 : index
    %11 = vector.load %arg5[%c14_13, %c256_14] : memref<56x384xf32, #tpu.memory_space<vmem>>, vector<14x128xf32>
    tpu.vector_store %arg5[%c14_13, %c256_14], %10 {strides = array<i32>} : memref<56x384xf32, #tpu.memory_space<vmem>>, vector<14x128xf32>,
    %c32 = arith.constant 32 : index
    %c0_15 = arith.constant 0 : index
    %12 = vector.load %arg1[%c32, %c0_15] : memref<64x128xf32, #tpu.memory_space<vmem>>, vector<14x128xf32>
    %c28 = arith.constant 28 : index
    %c0_16 = arith.constant 0 : index
    %13 = vector.load %arg5[%c28, %c0_16] : memref<56x384xf32, #tpu.memory_space<vmem>>, vector<14x128xf32>
    tpu.vector_store %arg5[%c28, %c0_16], %12 {strides = array<i32>} : memref<56x384xf32, #tpu.memory_space<vmem>>, vector<14x128xf32>,
    %c33 = arith.constant 33 : index
    %c0_17 = arith.constant 0 : index
    %14 = vector.load %arg1[%c33, %c0_17] : memref<64x128xf32, #tpu.memory_space<vmem>>, vector<14x128xf32>
    %c28_18 = arith.constant 28 : index
    %c128_19 = arith.constant 128 : index
    %15 = vector.load %arg5[%c28_18, %c128_19] : memref<56x384xf32, #tpu.memory_space<vmem>>, vector<14x128xf32>
    tpu.vector_store %arg5[%c28_18, %c128_19], %14 {strides = array<i32>} : memref<56x384xf32, #tpu.memory_space<vmem>>, vector<14x128xf32>,
    %c34 = arith.constant 34 : index
    %c0_20 = arith.constant 0 : index
    %16 = vector.load %arg1[%c34, %c0_20] : memref<64x128xf32, #tpu.memory_space<vmem>>, vector<14x128xf32>
    %c28_21 = arith.constant 28 : index
    %c256_22 = arith.constant 256 : index
    %17 = vector.load %arg5[%c28_21, %c256_22] : memref<56x384xf32, #tpu.memory_space<vmem>>, vector<14x128xf32>
    tpu.vector_store %arg5[%c28_21, %c256_22], %16 {strides = array<i32>} : memref<56x384xf32, #tpu.memory_space<vmem>>, vector<14x128xf32>,
    %c48 = arith.constant 48 : index
    %c0_23 = arith.constant 0 : index
    %18 = vector.load %arg1[%c48, %c0_23] : memref<64x128xf32, #tpu.memory_space<vmem>>, vector<14x128xf32>
    %c42 = arith.constant 42 : index
    %c0_24 = arith.constant 0 : index
    %19 = vector.load %arg5[%c42, %c0_24] : memref<56x384xf32, #tpu.memory_space<vmem>>, vector<14x128xf32>
    tpu.vector_store %arg5[%c42, %c0_24], %18 {strides = array<i32>} : memref<56x384xf32, #tpu.memory_space<vmem>>, vector<14x128xf32>,
    %c49 = arith.constant 49 : index
    %c0_25 = arith.constant 0 : index
    %20 = vector.load %arg1[%c49, %c0_25] : memref<64x128xf32, #tpu.memory_space<vmem>>, vector<14x128xf32>
    %c42_26 = arith.constant 42 : index
    %c128_27 = arith.constant 128 : index
    %21 = vector.load %arg5[%c42_26, %c128_27] : memref<56x384xf32, #tpu.memory_space<vmem>>, vector<14x128xf32>
    tpu.vector_store %arg5[%c42_26, %c128_27], %20 {strides = array<i32>} : memref<56x384xf32, #tpu.memory_space<vmem>>, vector<14x128xf32>,
    %c50 = arith.constant 50 : index
    %c0_28 = arith.constant 0 : index
    %22 = vector.load %arg1[%c50, %c0_28] : memref<64x128xf32, #tpu.memory_space<vmem>>, vector<14x128xf32>
    %c42_29 = arith.constant 42 : index
    %c256_30 = arith.constant 256 : index
    %23 = vector.load %arg5[%c42_29, %c256_30] : memref<56x384xf32, #tpu.memory_space<vmem>>, vector<14x128xf32>
    tpu.vector_store %arg5[%c42_29, %c256_30], %22 {strides = array<i32>} : memref<56x384xf32, #tpu.memory_space<vmem>>, vector<14x128xf32>,
    %c0_31 = arith.constant 0 : index
    %c0_32 = arith.constant 0 : index
    %24 = vector.load %arg5[%c0_31, %c0_32] : memref<56x384xf32, #tpu.memory_space<vmem>>, vector<56x384xf32>
    %c0_33 = arith.constant 0 : index
    %c0_34 = arith.constant 0 : index
    %25 = vector.load %arg2[%c0_33, %c0_34] : memref<384x128xf32, #tpu.memory_space<vmem>>, vector<384x128xf32>
    %cst = arith.constant dense<0.000000e+00> : vector<56x128xf32>
    %26 = tpu.matmul %24, %25, %cst {dimension_numbers = #tpu.dot_dimension_numbers<[1], [0], [0], [1], [0, 0, 1, 1], [], []>} : vector<56x384xf32>, vector<384x128xf32>, vector<56x128xf32> -> vector<56x128xf32>
    %27 = vector.extract_strided_slice %26 {offsets = [0, 0], sizes = [12, 128], strides = [1, 1]} : vector<56x128xf32> to vector<12x128xf32>
    %c0_35 = arith.constant 0 : index
    %c0_36 = arith.constant 0 : index
    %28 = vector.load %arg5[%c0_35, %c0_36] : memref<56x384xf32, #tpu.memory_space<vmem>>, vector<12x128xf32>
    tpu.vector_store %arg5[%c0_35, %c0_36], %27 {strides = array<i32>} : memref<56x384xf32, #tpu.memory_space<vmem>>, vector<12x128xf32>,
    %29 = vector.extract_strided_slice %26 {offsets = [1, 0], sizes = [12, 128], strides = [1, 1]} : vector<56x128xf32> to vector<12x128xf32>
    %c0_37 = arith.constant 0 : index
    %c128_38 = arith.constant 128 : index
    %30 = vector.load %arg5[%c0_37, %c128_38] : memref<56x384xf32, #tpu.memory_space<vmem>>, vector<12x128xf32>
    tpu.vector_store %arg5[%c0_37, %c128_38], %29 {strides = array<i32>} : memref<56x384xf32, #tpu.memory_space<vmem>>, vector<12x128xf32>,
    %31 = vector.extract_strided_slice %26 {offsets = [2, 0], sizes = [12, 128], strides = [1, 1]} : vector<56x128xf32> to vector<12x128xf32>
    %c0_39 = arith.constant 0 : index
    %c256_40 = arith.constant 256 : index
    %32 = vector.load %arg5[%c0_39, %c256_40] : memref<56x384xf32, #tpu.memory_space<vmem>>, vector<12x128xf32>
    tpu.vector_store %arg5[%c0_39, %c256_40], %31 {strides = array<i32>} : memref<56x384xf32, #tpu.memory_space<vmem>>, vector<12x128xf32>,
    %33 = vector.extract_strided_slice %26 {offsets = [14, 0], sizes = [12, 128], strides = [1, 1]} : vector<56x128xf32> to vector<12x128xf32>
    %c12 = arith.constant 12 : index
    %c0_41 = arith.constant 0 : index
    %34 = vector.load %arg5[%c12, %c0_41] : memref<56x384xf32, #tpu.memory_space<vmem>>, vector<12x128xf32>
    tpu.vector_store %arg5[%c12, %c0_41], %33 {strides = array<i32>} : memref<56x384xf32, #tpu.memory_space<vmem>>, vector<12x128xf32>,
    %35 = vector.extract_strided_slice %26 {offsets = [15, 0], sizes = [12, 128], strides = [1, 1]} : vector<56x128xf32> to vector<12x128xf32>
    %c12_42 = arith.constant 12 : index
    %c128_43 = arith.constant 128 : index
    %36 = vector.load %arg5[%c12_42, %c128_43] : memref<56x384xf32, #tpu.memory_space<vmem>>, vector<12x128xf32>
    tpu.vector_store %arg5[%c12_42, %c128_43], %35 {strides = array<i32>} : memref<56x384xf32, #tpu.memory_space<vmem>>, vector<12x128xf32>,
    %37 = vector.extract_strided_slice %26 {offsets = [16, 0], sizes = [12, 128], strides = [1, 1]} : vector<56x128xf32> to vector<12x128xf32>
    %c12_44 = arith.constant 12 : index
    %c256_45 = arith.constant 256 : index
    %38 = vector.load %arg5[%c12_44, %c256_45] : memref<56x384xf32, #tpu.memory_space<vmem>>, vector<12x128xf32>
    tpu.vector_store %arg5[%c12_44, %c256_45], %37 {strides = array<i32>} : memref<56x384xf32, #tpu.memory_space<vmem>>, vector<12x128xf32>,
    %39 = vector.extract_strided_slice %26 {offsets = [28, 0], sizes = [12, 128], strides = [1, 1]} : vector<56x128xf32> to vector<12x128xf32>
    %c24 = arith.constant 24 : index
    %c0_46 = arith.constant 0 : index
    %40 = vector.load %arg5[%c24, %c0_46] : memref<56x384xf32, #tpu.memory_space<vmem>>, vector<12x128xf32>
    tpu.vector_store %arg5[%c24, %c0_46], %39 {strides = array<i32>} : memref<56x384xf32, #tpu.memory_space<vmem>>, vector<12x128xf32>,
    %41 = vector.extract_strided_slice %26 {offsets = [29, 0], sizes = [12, 128], strides = [1, 1]} : vector<56x128xf32> to vector<12x128xf32>
    %c24_47 = arith.constant 24 : index
    %c128_48 = arith.constant 128 : index
    %42 = vector.load %arg5[%c24_47, %c128_48] : memref<56x384xf32, #tpu.memory_space<vmem>>, vector<12x128xf32>
    tpu.vector_store %arg5[%c24_47, %c128_48], %41 {strides = array<i32>} : memref<56x384xf32, #tpu.memory_space<vmem>>, vector<12x128xf32>,
    %43 = vector.extract_strided_slice %26 {offsets = [30, 0], sizes = [12, 128], strides = [1, 1]} : vector<56x128xf32> to vector<12x128xf32>
    %c24_49 = arith.constant 24 : index
    %c256_50 = arith.constant 256 : index
    %44 = vector.load %arg5[%c24_49, %c256_50] : memref<56x384xf32, #tpu.memory_space<vmem>>, vector<12x128xf32>
    tpu.vector_store %arg5[%c24_49, %c256_50], %43 {strides = array<i32>} : memref<56x384xf32, #tpu.memory_space<vmem>>, vector<12x128xf32>,
    %45 = vector.extract_strided_slice %26 {offsets = [42, 0], sizes = [12, 128], strides = [1, 1]} : vector<56x128xf32> to vector<12x128xf32>
    %c36 = arith.constant 36 : index
    %c0_51 = arith.constant 0 : index
    %46 = vector.load %arg5[%c36, %c0_51] : memref<56x384xf32, #tpu.memory_space<vmem>>, vector<12x128xf32>
    tpu.vector_store %arg5[%c36, %c0_51], %45 {strides = array<i32>} : memref<56x384xf32, #tpu.memory_space<vmem>>, vector<12x128xf32>,
    %47 = vector.extract_strided_slice %26 {offsets = [43, 0], sizes = [12, 128], strides = [1, 1]} : vector<56x128xf32> to vector<12x128xf32>
    %c36_52 = arith.constant 36 : index
    %c128_53 = arith.constant 128 : index
    %48 = vector.load %arg5[%c36_52, %c128_53] : memref<56x384xf32, #tpu.memory_space<vmem>>, vector<12x128xf32>
    tpu.vector_store %arg5[%c36_52, %c128_53], %47 {strides = array<i32>} : memref<56x384xf32, #tpu.memory_space<vmem>>, vector<12x128xf32>,
    %49 = vector.extract_strided_slice %26 {offsets = [44, 0], sizes = [12, 128], strides = [1, 1]} : vector<56x128xf32> to vector<12x128xf32>
    %c36_54 = arith.constant 36 : index
    %c256_55 = arith.constant 256 : index
    %50 = vector.load %arg5[%c36_54, %c256_55] : memref<56x384xf32, #tpu.memory_space<vmem>>, vector<12x128xf32>
    tpu.vector_store %arg5[%c36_54, %c256_55], %49 {strides = array<i32>} : memref<56x384xf32, #tpu.memory_space<vmem>>, vector<12x128xf32>,
    %c0_56 = arith.constant 0 : index
    %c0_57 = arith.constant 0 : index
    %51 = vector.load %arg5[%c0_56, %c0_57] : memref<56x384xf32, #tpu.memory_space<vmem>>, vector<48x384xf32>
    %c0_58 = arith.constant 0 : index
    %c0_59 = arith.constant 0 : index
    %52 = vector.load %arg3[%c0_58, %c0_59] : memref<384x128xf32, #tpu.memory_space<vmem>>, vector<384x128xf32>
    %cst_60 = arith.constant dense<0.000000e+00> : vector<48x128xf32>
    %53 = tpu.matmul %51, %52, %cst_60 {dimension_numbers = #tpu.dot_dimension_numbers<[1], [0], [0], [1], [0, 0, 1, 1], [], []>} : vector<48x384xf32>, vector<384x128xf32>, vector<48x128xf32> -> vector<48x128xf32>
    %c0_61 = arith.constant 0 : index
    %c0_62 = arith.constant 0 : index
    %54 = vector.load %arg4[%c0_61, %c0_62] : memref<48x128xf32, #tpu.memory_space<vmem>>, vector<48x128xf32>
    tpu.vector_store %arg4[%c0_61, %c0_62], %53 {strides = array<i32>} : memref<48x128xf32, #tpu.memory_space<vmem>>, vector<48x128xf32>,
    return
  }
  func.func @transform_0(%arg0: i32) -> (i32, i32) {
    %c0_i32 = arith.constant 0 : i32
    %c0_i32_0 = arith.constant 0 : i32
    return %arg0, %c0_i32 : i32, i32
  }
  func.func @transform_1(%arg0: i32) -> (i32, i32) {
    %c0_i32 = arith.constant 0 : i32
    %c0_i32_0 = arith.constant 0 : i32
    %c0_i32_1 = arith.constant 0 : i32
    return %c0_i32, %c0_i32_0 : i32, i32
  }
  func.func @transform_2(%arg0: i32) -> (i32, i32) {
    %c0_i32 = arith.constant 0 : i32
    %c0_i32_0 = arith.constant 0 : i32
    %c0_i32_1 = arith.constant 0 : i32
    return %c0_i32, %c0_i32_0 : i32, i32
  }
  func.func @transform_3(%arg0: i32) -> (i32, i32) {
    %c0_i32 = arith.constant 0 : i32
    %c0_i32_0 = arith.constant 0 : i32
    return %arg0, %c0_i32 : i32, i32
  }
}

</mosaic_0001>

<bundles_post_ra>
// kernel: stacked_conv2d_forward.1
= control target key start
LH: loop header
LB: loop body
LE: loop exit
PB: predicated region body
PF: predicated region fallthrough
CT: control target
= control target key end

     0   :  { %vm70_vm0 = vcmask 1043456   ;;  %vm110_vm1 = vcmask 1041408   ;;  %vm30_vm2 = vcmask 1045504   ;;  %vm327_vm3 = vcmask 1046528   ;;  %s1111_s1 = inlined_call_operand.vmem [shape: f32[384,128], index: 1, kind: input, shape index: {}]   ;;  %s1112_s0 = inlined_call_operand.vmem [shape: f32[64,128], index: 0, kind: input, shape index: {}]   ;;  %s1113_s2 = inlined_call_operand.vmem [shape: f32[384,128], index: 2, kind: input, shape index: {}]   ;;  %s1114_s3 = inlined_call_operand.vmem [shape: f32[48,128], index: 3, kind: output, shape index: {}]  }
   0x1   :  { %v208_v0 = vld [vmem:[%s1111_s1 + $0x178] sm:$0xff]  ;;  %v207_v1 = vld [vmem:[%s1111_s1 + $0x170] sm:$0xff]  ;;  %v206_v5 = vld [vmem:[%s1111_s1 + $0x168] sm:$0xff]  ;;  %vm352_vm4 = vcmask 1044480   ;;  %vm377_vm5 = vcmask 1042432   ;;  %vm403_vm6 = vcmask 1040384  }
   0x2   :  { %v176_v2 = vld [vmem:[%s1111_s1 + $0x78] sm:$0xff]  ;;  %285 = vmatpush.msra.mxu2 %v208_v0  ;;  %v175_v4 = vld [vmem:[%s1111_s1 + $0x70] sm:$0xff]  ;;  %v174_v7 = vld [vmem:[%s1111_s1 + $0x68] sm:$0xff] }
   0x3   :  { %209 = vmatpush.msra.mxu0 %v176_v2  ;;  %v192_v3 = vld [vmem:[%s1111_s1 + $0xf8] sm:$0xff]  ;;  %v191_v6 = vld [vmem:[%s1111_s1 + $0xf0] sm:$0xff]  ;;  %v190_v8 = vld [vmem:[%s1111_s1 + $0xe8] sm:$0xff] }
   0x4   :  { %247 = vmatpush.msra.mxu1 %v192_v3  ;;  %286 = vmatpush.msra.mxu2 %v207_v1  ;;  %v205_v9 = vld [vmem:[%s1111_s1 + $0x160] sm:$0xff]  ;;  %v204_v12 = vld [vmem:[%s1111_s1 + $0x158] sm:$0xff]  ;;  %v203_v15 = vld [vmem:[%s1111_s1 + $0x150] sm:$0xff] }
   0x5   :  { %210 = vmatpush.msra.mxu0 %v175_v4  ;;  %v173_v10 = vld [vmem:[%s1111_s1 + $0x60] sm:$0xff]  ;;  %v172_v13 = vld [vmem:[%s1111_s1 + $0x58] sm:$0xff]  ;;  %v171_v16 = vld [vmem:[%s1111_s1 + $0x50] sm:$0xff] }
   0x6   :  { %248 = vmatpush.msra.mxu1 %v191_v6  ;;  %287 = vmatpush.msra.mxu2 %v206_v5  ;;  %v189_v11 = vld [vmem:[%s1111_s1 + $0xe0] sm:$0xff]  ;;  %v188_v14 = vld [vmem:[%s1111_s1 + $0xd8] sm:$0xff]  ;;  %v187_v17 = vld [vmem:[%s1111_s1 + $0xd0] sm:$0xff] }
   0x7   :  { %211 = vmatpush.msra.mxu0 %v174_v7  ;;  %v202_v18 = vld [vmem:[%s1111_s1 + $0x148] sm:$0xff]  ;;  %v201_v21 = vld [vmem:[%s1111_s1 + $0x140] sm:$0xff]  ;;  %v200_v24 = vld [vmem:[%s1111_s1 + $0x138] sm:$0xff] }
   0x8   :  { %249 = vmatpush.msra.mxu1 %v190_v8  ;;  %288 = vmatpush.msra.mxu2 %v205_v9  ;;  %v170_v19 = vld [vmem:[%s1111_s1 + $0x48] sm:$0xff]  ;;  %v169_v22 = vld [vmem:[%s1111_s1 + $0x40] sm:$0xff]  ;;  %v168_v25 = vld [vmem:[%s1111_s1 + $0x38] sm:$0xff] }
   0x9   :  { %212 = vmatpush.msra.mxu0 %v173_v10  ;;  %v186_v20 = vld [vmem:[%s1111_s1 + $0xc8] sm:$0xff]  ;;  %v185_v23 = vld [vmem:[%s1111_s1 + $0xc0] sm:$0xff]  ;;  %v199_v26 = vld [vmem:[%s1111_s1 + $0x130] sm:$0xff] }
   0xa   :  { %250 = vmatpush.msra.mxu1 %v189_v11  ;;  %289 = vmatpush.msra.mxu2 %v204_v12  ;;  %v184_v27 = vld [vmem:[%s1111_s1 + $0xb8] sm:$0xff]  ;;  %v198_v28 = vld [vmem:[%s1111_s1 + $0x128] sm:$0xff]  ;;  %v167_v29 = vld [vmem:[%s1111_s1 + $0x30] sm:$0xff] }
   0xb   :  { %213 = vmatpush.msra.mxu0 %v172_v13  ;;  %v183_v30 = vld [vmem:[%s1111_s1 + $0xb0] sm:$0xff]  ;;  %v166_v31 = vld [vmem:[%s1111_s1 + $0x28] sm:$0xff]  ;;  %v197_v36 = vld [vmem:[%s1111_s1 + $0x120] sm:$0xff] }
   0xc   :  { %251 = vmatpush.msra.mxu1 %v188_v14  ;;  %290 = vmatpush.msra.mxu2 %v203_v15  ;;  %v182_v32 = vld [vmem:[%s1111_s1 + $0xa8] sm:$0xff]  ;;  %v751_v34 = vld [vmem:[%s1112_s0 + $0x12] sm:$0xff]  ;;  %v165_v37 = vld [vmem:[%s1111_s1 + $0x20] sm:$0xff] }
   0xd   :  { %214 = vmatpush.msra.mxu0 %v171_v16  ;;  %v23_v33 = vld [vmem:[%s1112_s0 + $0xa] sm:$0x3f]  ;;  %v57_v38 = vrot.slane %v751_v34, 2  ;;  %v766_v39 = vld [vmem:[%s1112_s0 + $0x10] sm:$0xff]  ;;  %v181_v41 = vld [vmem:[%s1111_s1 + $0xa0] sm:$0xff] }
   0xe   :  { %252 = vmatpush.msra.mxu1 %v187_v17  ;;  %291 = vmatpush.msra.mxu2 %v202_v18  ;;  %v15_v35 = vld [vmem:[%s1112_s0 + $0x8] sm:$0x3f]  ;;  %25 = vst [vmem:[#allocation2 + $0x78] sm:$0x3f] %v23_v33  ;;  %v31_v42 = vrot.slane %v766_v39, 2  ;;  %v778_v43 = vld [vmem:[%s1112_s0 + $0x11] sm:$0xff] }
   0xf   :  { %215 = vmatpush.msra.mxu0 %v170_v19  ;;  %v19_v40 = vld [vmem:[%s1112_s0 + $0x9] sm:$0x3f]  ;;  %17 = vst [vmem:[#allocation2 + $0x48] sm:$0x3f] %v15_v35  ;;  %v783_v44 = vld [vmem:[%s1112_s0 + $0x1a] sm:$0x3f] }
  0x10   :  { %253 = vmatpush.msra.mxu1 %v186_v20  ;;  %292 = vmatpush.msra.mxu2 %v201_v21  ;;  %v196_v45 = vld [vmem:[%s1111_s1 + $0x118] sm:$0xff]  ;;  %63 = vst [vmem:[#allocation2 + $0x78] sm:$0xc0] %v57_v38  ;;  %v44_v46 = vrot.slane %v778_v43, 2  ;;  %v58_v47 = vrot.slane %v783_v44, 2  ;;  %v93_v51 = vld [vmem:[%s1112_s0 + $0x22] sm:$0xff] }
  0x11   :  { %216 = vmatpush.msra.mxu0 %v169_v22  ;;  %v795_v48 = vld [vmem:[%s1112_s0 + $0x18] sm:$0x3f]  ;;  %37 = vst [vmem:[#allocation2 + $0x48] sm:$0xc0] %v31_v42  ;;  %v66_v54 = vld [vmem:[%s1112_s0 + $0x20] sm:$0xff]  ;;  %v97_v57 = vrot.slane %v93_v51, 4 }
  0x12   :  { %254 = vmatpush.msra.mxu1 %v185_v23  ;;  %293 = vmatpush.msra.mxu2 %v200_v24  ;;  %v32_v49 = vrot.slane %v795_v48, 2  ;;  %v803_v50 = vld [vmem:[%s1112_s0 + $0x19] sm:$0x3f]  ;;  %21 = vst [vmem:[#allocation2 + $0x20] sm:$0x3f] %v19_v40  ;;  %v818_v55 = vld [vmem:[%s1112_s0 + $0x21] sm:$0xff] }
  0x13   :  { %217 = vmatpush.msra.mxu0 %v168_v25  ;;  %v164_v52 = vld [vmem:[%s1111_s1 + $0x18] sm:$0xff]  ;;  %v45_v53 = vrot.slane %v803_v50, 2  ;;  %50 = vst [vmem:[#allocation2 + $0x20] sm:$0xc0] %v44_v46  ;;  %v195_v58 = vld [vmem:[%s1111_s1 + $0x110] sm:$0xff]  ;;  %v71_v60 = vrot.slane %v66_v54, 4 }
  0x14   :  { %255 = vmatpush.msra.mxu1 %v184_v27  ;;  %294 = vmatpush.msra.mxu2 %v199_v26  ;;  %v180_v56 = vld [vmem:[%s1111_s1 + $0x98] sm:$0xff]  ;;  %v163_v59 = vld [vmem:[%s1111_s1 + $0x10] sm:$0xff]  ;;  %65 = vst [vmem:[#allocation2 + $0x38] sm:$0xf] %v58_v47  ;;  %v84_v62 = vrot.slane %v818_v55, 4  ;;  %v194_v0 = vld [vmem:[%s1111_s1 + $0x108] sm:$0xff] }
  0x15   :  { %218 = vmatpush.msra.mxu0 %v167_v29  ;;  %v179_v61 = vld [vmem:[%s1111_s1 + $0x90] sm:$0xff]  ;;  %39 = vst [vmem:[#allocation2 + $0x70] sm:$0xf] %v32_v49  ;;  %v94_v63 = vld [vmem:[%s1112_s0 + $0x2a] sm:$0x3f]  ;;  %v193_v4 = vld [vmem:[%s1111_s1 + $0x100] sm:$0xff]  ;;  %v59_v29 = vsel %vm30_vm2, %v57_v38, %v58_v47 }
  0x16   :  { %256 = vmatpush.msra.mxu1 %v183_v30  ;;  %295 = vmatpush.msra.mxu2 %v198_v28  ;;  %v162_v1 = vld [vmem:[%s1111_s1 + $0x8] sm:$0xff]  ;;  %52 = vst [vmem:[#allocation2 + $0x88] sm:$0xf] %v45_v53  ;;  %v98_v2 = vrot.slane %v94_v63, 4  ;;  %v161_v5 = vld [vmem:[%s1111_s1] sm:$0xff]  ;;  %v129_v9 = vld [vmem:[%s1112_s0 + $0x32] sm:$0xff]  ;;  %v33_v30 = vsel %vm30_vm2, %v31_v42, %v32_v49 }
  0x17   :  { %219 = vmatpush.msra.mxu0 %v166_v31  ;;  %v178_v3 = vld [vmem:[%s1111_s1 + $0x88] sm:$0xff]  ;;  %103 = vst [vmem:[#allocation2 + $0x38] sm:$0xf0] %v97_v57  ;;  %v177_v7 = vld [vmem:[%s1111_s1 + $0x80] sm:$0xff]  ;;  %v133_v12 = vrot.slane %v129_v9, 6  ;;  %v106_v17 = vld [vmem:[%s1112_s0 + $0x30] sm:$0xff]  ;;  %v46_v31 = vsel %vm30_vm2, %v44_v46, %v45_v53 }
  0x18   :  { %257 = vmatpush.msra.mxu1 %v182_v32  ;;  %296 = vmatpush.msra.mxu2 %v197_v36  ;;  %77 = vst [vmem:[#allocation2 + $0x70] sm:$0xf0] %v71_v60  ;;  %v22_v6 = vld [vmem:[%s1112_s0 + $0x2] sm:$0xff]  ;;  %v866_v8 = vsel %vm70_vm0, %v97_v57, %v98_v2  ;;  %v118_v18 = vld [vmem:[%s1112_s0 + $0x31] sm:$0xff]  ;;  %v111_v20 = vrot.slane %v106_v17, 6 }
  0x19   :  { %220 = vmatpush.msra.mxu0 %v165_v37  ;;  %90 = vst [vmem:[#allocation2 + $0x88] sm:$0xf0] %v84_v62  ;;  %v14_v10 = vld [vmem:[%s1112_s0] sm:$0xff]  ;;  %v67_v13 = vld [vmem:[%s1112_s0 + $0x28] sm:$0x3f]  ;;  %v122_v22 = vrot.slane %v118_v18, 6 }
  0x1a   :  { %258 = vmatpush.msra.mxu1 %v181_v41  ;;  %297 = vmatpush.msra.mxu2 %v196_v45  ;;  %v18_v11 = vld [vmem:[%s1112_s0 + $0x1] sm:$0xff]  ;;  %104 = vst [vmem:[#allocation2 + $0x10] sm:$0xff] %v866_v8  ;;  %v81_v14 = vld [vmem:[%s1112_s0 + $0x29] sm:$0x3f]  ;;  %v72_v15 = vrot.slane %v67_v13, 4  ;;  %v145_v23 = vld [vmem:[#allocation2 + $0x78] sm:$0xff] }
  0x1b   :  { %221 = vmatpush.msra.mxu0 %v164_v52  ;;  %105 = vst [vmem:[#allocation2 + $0x50] sm:$0x3] %v98_v2  ;;  %v85_v16 = vrot.slane %v81_v14, 4  ;;  %v143_v24 = vld [vmem:[#allocation2 + $0x48] sm:$0xff]  ;;  %v144_v25 = vld [vmem:[#allocation2 + $0x20] sm:$0xff]  ;;  %v446_v36 = vld [vmem:[%s1113_s2 + $0x78] sm:$0xff] }
  0x1c   :  { %259 = vmatpush.msra.mxu1 %v180_v56  ;;  %298 = vmatpush.msra.mxu2 %v195_v58  ;;  %138 = vst [vmem:[#allocation2 + $0x50] sm:$0xfc] %v133_v12  ;;  %v891_v19 = vsel %vm70_vm0, %v71_v60, %v72_v15  ;;  %v130_v26 = vld [vmem:[%s1112_s0 + $0x3a] sm:$0x3f]  ;;  %v445_v37 = vld [vmem:[%s1113_s2 + $0x70] sm:$0xff]  ;;  %v444_v39 = vld [vmem:[%s1113_s2 + $0x68] sm:$0xff] }
  0x1d   :  { %222 = vmatpush.msra.mxu0 %v163_v59  ;;  %79 = vst [vmem:[#allocation2 + $0x90] sm:$0x3] %v72_v15  ;;  %v895_v21 = vsel %vm70_vm0, %v84_v62, %v85_v16  ;;  %v134_v27 = vrot.slane %v130_v26, 6  ;;  %v107_v32 = vld [vmem:[%s1112_s0 + $0x38] sm:$0x3f]  ;;  %594 = vmatpush.msra.mxu3 %v446_v36  ;;  %v477_v41 = vld [vmem:[%s1113_s2 + $0x170] sm:$0xff] }
  0x1e   :  { %260 = vmatpush.msra.mxu1 %v179_v61  ;;  %299 = vmatpush.msra.mxu2 %v194_v0  ;;  %78 = vst [vmem:[#allocation2 + $0x60] sm:$0xff] %v891_v19  ;;  %v119_v33 = vld [vmem:[%s1112_s0 + $0x39] sm:$0x3f]  ;;  %v112_v34 = vrot.slane %v107_v32, 6  ;;  %v476_v44 = vld [vmem:[%s1113_s2 + $0x168] sm:$0xff]  ;;  %v443_v47 = vld [vmem:[%s1113_s2 + $0x60] sm:$0xff] }
  0x1f   :  { %223 = vmatpush.msra.mxu0 %v162_v1  ;;  %91 = vst [vmem:[#allocation2 + $0x98] sm:$0xff] %v895_v21  ;;  %v902_v28 = vsel %vm110_vm1, %v133_v12, %v134_v27  ;;  %v123_v35 = vrot.slane %v119_v33, 6  ;;  %v478_v40 = vld [vmem:[%s1113_s2 + $0x178] sm:$0xff]  ;;  %595 = vmatpush.msra.mxu3 %v445_v37  ;;  %v149_v45 = vld [vmem:[#allocation2 + $0x70] sm:$0xff]  ;;  %v475_v48 = vld [vmem:[%s1113_s2 + $0x160] sm:$0xff] }
  0x20   :  { %261 = vmatpush.msra.mxu1 %v178_v3  ;;  %300 = vmatpush.msra.mxu2 %v193_v4  ;;  %92 = vst [vmem:[#allocation2 + $0x58] sm:$0x3] %v85_v16  ;;  %v113_v38 = vsel %vm110_vm1, %v111_v20, %v112_v34  ;;  %v151_v43 = vld [vmem:[#allocation2 + $0x38] sm:$0xff]  ;;  %v150_v46 = vld [vmem:[#allocation2 + $0x88] sm:$0xff]  ;;  %v441_v50 = vld [vmem:[%s1113_s2 + $0x50] sm:$0xff] }
  0x21   :  { %224 = vmatpush.msra.mxu0 %v161_v5  ;;  %301 = vmatmul.f32.vlgmr.msra.gmra.mxu2 %v22_v6  ;;  %116 = vst [vmem:[#allocation2 + $0x90] sm:$0xfc] %v111_v20  ;;  %v124_v42 = vsel %vm110_vm1, %v122_v22, %v123_v35  ;;  %v442_v49 = vld [vmem:[%s1113_s2 + $0x58] sm:$0xff]  ;;  %v440_v51 = vld [vmem:[%s1113_s2 + $0x48] sm:$0xff]  ;;  %v439_v52 = vld [vmem:[%s1113_s2 + $0x40] sm:$0xff] }
  0x22   :  { %262 = vmatpush.msra.mxu1 %v177_v7  ;;  %225 = vmatmul.f32.vlgmr.msra.gmra.mxu0 %v14_v10  ;;  %127 = vst [vmem:[#allocation2 + $0x58] sm:$0xfc] %v122_v22  ;;  %v438_v53 = vld [vmem:[%s1113_s2 + $0x38] sm:$0xff]  ;;  %v437_v57 = vld [vmem:[%s1113_s2 + $0x30] sm:$0xff]  ;;  %v436_v59 = vld [vmem:[%s1113_s2 + $0x28] sm:$0xff] }
  0x23   :  { %263 = vmatmul.f32.vlgmr.msra.gmra.mxu1 %v18_v11  ;;  %479 = vmatpush.msrb.mxu2 %v446_v36  ;;  %v157_v54 = vld [vmem:[#allocation2 + $0x50] sm:$0xff]  ;;  %v474_v58 = vld [vmem:[%s1113_s2 + $0x158] sm:$0xff]  ;;  %v435_v61 = vld [vmem:[%s1113_s2 + $0x20] sm:$0xff] }
  0x24   :  { %549 = vmatpush.msrb.mxu0 %v478_v40  ;;  %610 = vmatpush.msrb.mxu1 %v478_v40  ;;  %v473_v60 = vld [vmem:[%s1113_s2 + $0x150] sm:$0xff]  ;;  %v472_v62 = vld [vmem:[%s1113_s2 + $0x148] sm:$0xff]  ;;  %v434_v63 = vld [vmem:[%s1113_s2 + $0x18] sm:$0xff] }
  0x25   :  { %480 = vmatpush.msrb.mxu2 %v445_v37  ;;  %596 = vmatpush.msra.mxu3 %v444_v39  ;;  %v471_v0 = vld [vmem:[%s1113_s2 + $0x140] sm:$0xff]  ;;  %v433_v1 = vld [vmem:[%s1113_s2 + $0x10] sm:$0xff]  ;;  %v470_v2 = vld [vmem:[%s1113_s2 + $0x138] sm:$0xff] }
  0x26   :  { %550 = vmatpush.msrb.mxu0 %v477_v41  ;;  %611 = vmatpush.msrb.mxu1 %v477_v41  ;;  %v432_v3 = vld [vmem:[%s1113_s2 + $0x8] sm:$0xff]  ;;  %v469_v4 = vld [vmem:[%s1113_s2 + $0x130] sm:$0xff]  ;;  %v431_v5 = vld [vmem:[%s1113_s2] sm:$0xff] }
  0x27   :  { %481 = vmatpush.msrb.mxu2 %v444_v39  ;;  %597 = vmatpush.msra.mxu3 %v443_v47  ;;  %v468_v6 = vld [vmem:[%s1113_s2 + $0x128] sm:$0xff]  ;;  %v467_v7 = vld [vmem:[%s1113_s2 + $0x120] sm:$0xff]  ;;  %v465_v9 = vld [vmem:[%s1113_s2 + $0x110] sm:$0xff] }
  0x28   :  { %551 = vmatpush.msrb.mxu0 %v476_v44  ;;  %612 = vmatpush.msrb.mxu1 %v476_v44  ;;  %v155_v55 = vld [vmem:[#allocation2 + $0x90] sm:$0xff]  ;;  %v464_v10 = vld [vmem:[%s1113_s2 + $0x108] sm:$0xff]  ;;  %v463_v11 = vld [vmem:[%s1113_s2 + $0x100] sm:$0xff] }
  0x29   :  { %304 = vmatmul.f32.gmra.mxu2 %v145_v23  ;;  %598 = vmatpush.msra.mxu3 %v442_v49  ;;  %v156_v56 = vld [vmem:[#allocation2 + $0x58] sm:$0xff]  ;;  %v461_v23 = vld [vmem:[%s1113_s2 + $0xf0] sm:$0xff]  ;;  %v459_v34 = vld [vmem:[%s1113_s2 + $0xe0] sm:$0xff] }
  0x2a   :  { %228 = vmatmul.f32.gmra.mxu0 %v143_v24  ;;  %482 = vmatpush.msrb.mxu2 %v443_v47  ;;  %v458_v36 = vld [vmem:[%s1113_s2 + $0xd8] sm:$0xff] }
  0x2b   :  { %266 = vmatmul.f32.gmra.mxu1 %v144_v25  ;;  %552 = vmatpush.msrb.mxu0 %v475_v48 }
  0x2c   :  { %483 = vmatpush.msrb.mxu2 %v442_v49  ;;  %613 = vmatpush.msrb.mxu1 %v475_v48  ;;  %v455_v49 = vld [vmem:[%s1113_s2 + $0xc0] sm:$0xff] }
  0x2d   :  { %599 = vmatpush.msra.mxu3 %v441_v50  ;;  %553 = vmatpush.msrb.mxu0 %v474_v58 }
  0x2e   :  { %484 = vmatpush.msrb.mxu2 %v441_v50  ;;  %614 = vmatpush.msrb.mxu1 %v474_v58  ;;  %v454_v50 = vld [vmem:[%s1113_s2 + $0xb8] sm:$0xff] }
  0x2f   :  { %600 = vmatpush.msra.mxu3 %v440_v51  ;;  %554 = vmatpush.msrb.mxu0 %v473_v60 }
  0x30   :  { %485 = vmatpush.msrb.mxu2 %v440_v51  ;;  %615 = vmatpush.msrb.mxu1 %v473_v60 }
  0x31   :  { %307 = vmatmul.f32.gmra.mxu2 %v59_v29  ;;  %601 = vmatpush.msra.mxu3 %v439_v52 }
  0x32   :  { %231 = vmatmul.f32.gmra.mxu0 %v33_v30  ;;  %486 = vmatpush.msrb.mxu2 %v439_v52  ;;  %v460_v30 = vld [vmem:[%s1113_s2 + $0xe8] sm:$0xff]  ;;  %v453_v52 = vld [vmem:[%s1113_s2 + $0xb0] sm:$0xff] }
  0x33   :  { %269 = vmatmul.f32.gmra.mxu1 %v46_v31  ;;  %602 = vmatpush.msra.mxu3 %v438_v53 }
  0x34   :  { %487 = vmatpush.msrb.mxu2 %v438_v53  ;;  %555 = vmatpush.msrb.mxu0 %v472_v62 }
  0x35   :  { %603 = vmatpush.msra.mxu3 %v437_v57  ;;  %616 = vmatpush.msrb.mxu1 %v472_v62  ;;  %v451_v62 = vld [vmem:[%s1113_s2 + $0xa0] sm:$0xff] }
  0x36   :  { %488 = vmatpush.msrb.mxu2 %v437_v57  ;;  %556 = vmatpush.msrb.mxu0 %v471_v0 }
  0x37   :  { %604 = vmatpush.msra.mxu3 %v436_v59  ;;  %617 = vmatpush.msrb.mxu1 %v471_v0 }
  0x38   :  { %489 = vmatpush.msrb.mxu2 %v436_v59  ;;  %557 = vmatpush.msrb.mxu0 %v470_v2 }
  0x39   :  { %310 = vmatmul.f32.gmra.mxu2 %v151_v43  ;;  %605 = vmatpush.msra.mxu3 %v435_v61 }
  0x3a   :  { %234 = vmatmul.f32.gmra.mxu0 %v149_v45  ;;  %490 = vmatpush.msrb.mxu2 %v435_v61  ;;  %v456_v45 = vld [vmem:[%s1113_s2 + $0xc8] sm:$0xff] }
  0x3b   :  { %272 = vmatmul.f32.gmra.mxu1 %v150_v46  ;;  %606 = vmatpush.msra.mxu3 %v434_v63 }
  0x3c   :  { %491 = vmatpush.msrb.mxu2 %v434_v63  ;;  %618 = vmatpush.msrb.mxu1 %v470_v2 }
  0x3d   :  { %607 = vmatpush.msra.mxu3 %v433_v1  ;;  %558 = vmatpush.msrb.mxu0 %v469_v4 }
  0x3e   :  { %492 = vmatpush.msrb.mxu2 %v433_v1  ;;  %619 = vmatpush.msrb.mxu1 %v469_v4 }
  0x3f   :  { %608 = vmatpush.msra.mxu3 %v432_v3  ;;  %559 = vmatpush.msrb.mxu0 %v468_v6 }
  0x40   :  { %493 = vmatpush.msrb.mxu2 %v432_v3  ;;  %620 = vmatpush.msrb.mxu1 %v468_v6  ;;  %v450_v3 = vld [vmem:[%s1113_s2 + $0x98] sm:$0xff] }
  0x41   :  { %313 = vmatmul.f32.gmra.mxu2 %v866_v8  ;;  %609 = vmatpush.msra.mxu3 %v431_v5  ;;  %v466_v8 = vld [vmem:[%s1113_s2 + $0x118] sm:$0xff] }
  0x42   :  { %237 = vmatmul.f32.gmra.mxu0 %v891_v19  ;;  %494 = vmatpush.msrb.mxu2 %v431_v5  ;;  %v449_v5 = vld [vmem:[%s1113_s2 + $0x90] sm:$0xff] }
  0x43   :  { %275 = vmatmul.f32.gmra.mxu1 %v895_v21  ;;  %560 = vmatpush.msrb.mxu0 %v467_v7  ;;  %v462_v21 = vld [vmem:[%s1113_s2 + $0xf8] sm:$0xff] }
  0x44   :  { %621 = vmatpush.msrb.mxu1 %v467_v7  ;;  %514 = vmatpush.msrb.mxu3 %v462_v21 }
  0x45   :  { %561 = vmatpush.msrb.mxu0 %v466_v8 }
  0x46   :  { %622 = vmatpush.msrb.mxu1 %v466_v8  ;;  %515 = vmatpush.msrb.mxu3 %v461_v23  ;;  %v448_v8 = vld [vmem:[%s1113_s2 + $0x88] sm:$0xff] }
  0x47   :  { %562 = vmatpush.msrb.mxu0 %v465_v9 }
  0x48   :  { %623 = vmatpush.msrb.mxu1 %v465_v9  ;;  %516 = vmatpush.msrb.mxu3 %v460_v30 }
  0x49   :  { %316 = vmatmul.f32.gmra.mxu2 %v157_v54  ;;  %563 = vmatpush.msrb.mxu0 %v464_v10  ;;  %v452_v54 = vld [vmem:[%s1113_s2 + $0xa8] sm:$0xff] }
  0x4a   :  { %240 = vmatmul.f32.gmra.mxu0 %v155_v55  ;;  %624 = vmatpush.msrb.mxu1 %v464_v10 }
  0x4b   :  { %278 = vmatmul.f32.gmra.mxu1 %v156_v56  ;;  %564 = vmatpush.msrb.mxu0 %v463_v11 }
  0x4c   :  { %625 = vmatpush.msrb.mxu1 %v463_v11  ;;  %517 = vmatpush.msrb.mxu3 %v459_v34 }
  0x4e   :  { %518 = vmatpush.msrb.mxu3 %v458_v36 }
  0x51   :  { %319 = vmatmul.f32.gmra.mxu2 %v902_v28 }
  0x52   :  { %243 = vmatmul.f32.gmra.mxu0 %v113_v38  ;;  %v457_v38 = vld [vmem:[%s1113_s2 + $0xd0] sm:$0xff] }
  0x53   :  { %281 = vmatmul.f32.gmra.mxu1 %v124_v42  ;;  %519 = vmatpush.msrb.mxu3 %v457_v38 }
  0x55   :  { %520 = vmatpush.msrb.mxu3 %v456_v45 }
  0x57   :  { %521 = vmatpush.msrb.mxu3 %v455_v49 }
  0x59   :  { %522 = vmatpush.msrb.mxu3 %v454_v50 }
  0x5b   :  { %523 = vmatpush.msrb.mxu3 %v453_v52 }
  0x5d   :  { %524 = vmatpush.msrb.mxu3 %v452_v54 }
  0x5f   :  { %525 = vmatpush.msrb.mxu3 %v451_v62 }
  0x61   :  { %526 = vmatpush.msrb.mxu3 %v450_v3 }
  0x63   :  { %527 = vmatpush.msrb.mxu3 %v449_v5 }
  0x65   :  { %528 = vmatpush.msrb.mxu3 %v448_v8 }
  0x9f   :  { %v226_v12 = vpop.f32.mrf.mxu0 }
  0xa0   :  { %v264_v13 = vpop.f32.mrf.mxu1 }
  0xa1   :  { %v265_v14 = vadd.f32 %v264_v13, %v226_v12 }
  0xa4   :  { %v302_v15 = vpop.f32.mrf.mxu2 }
  0xa5   :  { %v303_v16 = vadd.f32 %v302_v15, %v265_v14 }
  0xa7   :  { %v229_v17 = vpop.f32.mrf.mxu0  ;;  %495 = vmatmul.f32.vlgmr.msrb.gmra.mxu2 %v303_v16  ;;  %v328_v24 = vrot.slane %v303_v16, 1  ;;  %v335_v25 = vrot.slane %v303_v16, 2  ;;  %v447_v16 = vld [vmem:[%s1113_s2 + $0x80] sm:$0xff] }
  0xa8   :  { %v267_v18 = vpop.f32.mrf.mxu1  ;;  %529 = vmatpush.msrb.mxu3 %v447_v16 }
  0xa9   :  { %v268_v19 = vadd.f32 %v267_v18, %v229_v17 }
  0xac   :  { %v305_v20 = vpop.f32.mrf.mxu2 }
  0xad   :  { %v306_v22 = vadd.f32 %v305_v20, %v268_v19 }
  0xaf   :  { %324 = vst [vmem:[#allocation2 + $0x48] sm:$0xf] %v306_v22  ;;  %v329_v26 = vrot.slane %v306_v22, 1  ;;  %v336_v27 = vrot.slane %v306_v22, 2  ;;  %v232_v28 = vpop.f32.mrf.mxu0  ;;  %v353_v39 = vrot.slane %v306_v22, 3 }
  0xb0   :  { %v270_v29 = vpop.f32.mrf.mxu1 }
  0xb1   :  { %v1036_v31 = vsel %vm327_vm3, %v328_v24, %v329_v26  ;;  %334 = vst [vmem:[#allocation2 + $0x20] sm:$0xf] %v329_v26  ;;  %v337_v32 = vsel %vm30_vm2, %v335_v25, %v336_v27  ;;  %v271_v33 = vadd.f32 %v270_v29, %v232_v28 }
  0xb2   :  { %565 = vmatmul.f32.vlgmr.msrb.gmra.mxu0 %v337_v32  ;;  %341 = vst [vmem:[#allocation2 + $0x78] sm:$0xf] %v336_v27 }
  0xb4   :  { %v308_v35 = vpop.f32.mrf.mxu2 }
  0xb5   :  { %v309_v37 = vadd.f32 %v308_v35, %v271_v33 }
  0xb7   :  { %v344_v40 = vrot.slane %v309_v37, 2  ;;  %v354_v41 = vrot.slane %v309_v37, 3  ;;  %v362_v42 = vrot.slane %v309_v37, 4  ;;  %v235_v43 = vpop.f32.mrf.mxu0 }
  0xb8   :  { %v273_v44 = vpop.f32.mrf.mxu1 }
  0xb9   :  { %v345_v46 = vsel %vm30_vm2, %v336_v27, %v344_v40  ;;  %v355_v47 = vsel %vm352_vm4, %v353_v39, %v354_v41  ;;  %367 = vst [vmem:[#allocation2 + $0x78] sm:$0xf0] %v362_v42  ;;  %v274_v48 = vadd.f32 %v273_v44, %v235_v43 }
  0xba   :  { %350 = vst [vmem:[#allocation2 + $0x48] sm:$0xf0] %v345_v46 }
  0xbb   :  { %360 = vst [vmem:[#allocation2 + $0x20] sm:$0xf0] %v355_v47 }
  0xbc   :  { %v311_v51 = vpop.f32.mrf.mxu2 }
  0xbd   :  { %v312_v53 = vadd.f32 %v311_v51, %v274_v48 }
  0xbf   :  { %v346_v55 = vrot.slane %v312_v53, 2  ;;  %v356_v56 = vrot.slane %v312_v53, 3  ;;  %v363_v57 = vrot.slane %v312_v53, 4  ;;  %v238_v58 = vpop.f32.mrf.mxu0  ;;  %v378_v7 = vrot.slane %v312_v53, 5 }
  0xc0   :  { %v276_v59 = vpop.f32.mrf.mxu1  ;;  %v418_v61 = vld [vmem:[#allocation2 + $0x78] sm:$0xff]  ;;  %v387_v9 = vrot.slane %v312_v53, 6 }
  0xc1   :  { %v277_v60 = vadd.f32 %v276_v59, %v238_v58  ;;  %v347_v63 = vsel %vm30_vm2, %v344_v40, %v346_v55  ;;  %v1070_v0 = vsel %vm352_vm4, %v354_v41, %v356_v56  ;;  %v364_v1 = vsel %vm70_vm0, %v362_v42, %v363_v57  ;;  %v416_v2 = vld [vmem:[#allocation2 + $0x48] sm:$0xff]  ;;  %568 = vmatmul.f32.gmra.mxu0 %v418_v61 }
  0xc2   :  { %498 = vmatmul.f32.gmra.mxu2 %v416_v2  ;;  %501 = vmatmul.f32.vlgmr.msra.gmra.mxu3 %v347_v63  ;;  %v417_v39 = vld [vmem:[#allocation2 + $0x20] sm:$0xff] }
  0xc4   :  { %v314_v4 = vpop.f32.mrf.mxu2 }
  0xc5   :  { %v315_v6 = vadd.f32 %v314_v4, %v277_v60 }
  0xc7   :  { %v370_v10 = vrot.slane %v315_v6, 4  ;;  %v379_v11 = vrot.slane %v315_v6, 5  ;;  %v388_v12 = vrot.slane %v315_v6, 6  ;;  %v241_v13 = vpop.f32.mrf.mxu0 }
  0xc8   :  { %v279_v14 = vpop.f32.mrf.mxu1 }
  0xc9   :  { %v280_v15 = vadd.f32 %v279_v14, %v241_v13  ;;  %v371_v17 = vsel %vm70_vm0, %v363_v57, %v370_v10  ;;  %375 = vst [vmem:[#allocation2 + $0x60] sm:$0xf] %v370_v10  ;;  %v380_v18 = vsel %vm377_vm5, %v378_v7, %v379_v11  ;;  %v389_v19 = vsel %vm110_vm1, %v387_v9, %v388_v12 }
  0xca   :  { %571 = vmatmul.f32.gmra.mxu0 %v364_v1  ;;  %374 = vst [vmem:[#allocation2 + $0x70] sm:$0xff] %v371_v17  ;;  %504 = vmatmul.f32.gmra.mxu3 %v371_v17 }
  0xcb   :  { %574 = vmatmul.f32.vlgmr.msrb.gmra.mxu1 %v389_v19  ;;  %385 = vst [vmem:[#allocation2 + $0x88] sm:$0xff] %v380_v18 }
  0xcc   :  { %394 = vst [vmem:[#allocation2 + $0x38] sm:$0xff] %v389_v19  ;;  %v317_v20 = vpop.f32.mrf.mxu2 }
  0xcd   :  { %v318_v21 = vadd.f32 %v317_v20, %v280_v15 }
  0xcf   :  { %v381_v22 = vrot.slane %v318_v21, 5  ;;  %v390_v23 = vrot.slane %v318_v21, 6  ;;  %411 = vst [vmem:[#allocation2 + $0x10] sm:$0xf0] %v318_v21  ;;  %v244_v24 = vpop.f32.mrf.mxu0  ;;  %v404_v26 = vrot.slane %v318_v21, 7 }
  0xd0   :  { %v282_v25 = vpop.f32.mrf.mxu1 }
  0xd1   :  { %v382_v27 = vsel %vm377_vm5, %v379_v11, %v381_v22  ;;  %v391_v28 = vsel %vm110_vm1, %v388_v12, %v390_v23  ;;  %401 = vst [vmem:[#allocation2 + $0x60] sm:$0xf0] %v390_v23  ;;  %v283_v29 = vadd.f32 %v282_v25, %v244_v24 }
  0xd2   :  { %386 = vst [vmem:[#allocation2 + $0x98] sm:$0xf] %v382_v27 }
  0xd3   :  { %395 = vst [vmem:[#allocation2 + $0x10] sm:$0xf] %v391_v28 }
  0xd4   :  { %409 = vst [vmem:[#allocation2 + $0x98] sm:$0xf0] %v404_v26  ;;  %v320_v30 = vpop.f32.mrf.mxu2 }
  0xd5   :  { %v321_v32 = vadd.f32 %v320_v30, %v283_v29 }
  0xd7   :  { %v397_v33 = vrot.slane %v321_v32, 6  ;;  %v405_v34 = vrot.slane %v321_v32, 7  ;;  %412 = vst [vmem:[#allocation2 + $0x50] sm:$0xff] %v321_v32 }
  0xd8   :  { %v425_v35 = vld [vmem:[#allocation2 + $0x60] sm:$0xff] }
  0xd9   :  { %v398_v36 = vsel %vm110_vm1, %v390_v23, %v397_v33  ;;  %v406_v37 = vsel %vm403_vm6, %v404_v26, %v405_v34  ;;  %507 = vmatmul.f32.gmra.mxu3 %v425_v35 }
  0xda   :  { %402 = vst [vmem:[#allocation2 + $0x90] sm:$0xff] %v398_v36  ;;  %v427_v38 = vld [vmem:[#allocation2 + $0x10] sm:$0xff] }
  0xdb   :  { %410 = vst [vmem:[#allocation2 + $0x58] sm:$0xff] %v406_v37  ;;  %577 = vmatmul.f32.gmra.mxu1 %v427_v38  ;;  %v426_v40 = vld [vmem:[#allocation2 + $0x98] sm:$0xff] }
  0xe1   :  { %510 = vmatmul.f32.gmra.mxu3 %v398_v36 }
  0xe3   :  { %580 = vmatmul.f32.gmra.mxu1 %v321_v32 }
  0xe9   :  { %530 = vmatmul.f32.vlgmr.msrb.gmra.mxu3 %v1036_v31 }
  0xf1   :  { %533 = vmatmul.f32.gmra.mxu3 %v417_v39 }
  0xf9   :  { %536 = vmatmul.f32.gmra.mxu3 %v1070_v0 }
 0x101   :  { %539 = vmatmul.f32.gmra.mxu3 %v380_v18 }
 0x109   :  { %542 = vmatmul.f32.gmra.mxu3 %v426_v40 }
 0x111   :  { %545 = vmatmul.f32.gmra.mxu3 %v406_v37 }
 0x12a   :  { %v496_v46 = vpop.f32.mrf.mxu2 }
 0x12f   :  { %v566_v45 = vpop.f32.mrf.mxu0 }
 0x13e   :  { %v569_v31 = vpop.f32.mrf.mxu0 }
 0x145   :  { %v502_v41 = vpop.f32.mrf.mxu3  ;;  %v499_v50 = vpop.f32.mrf.mxu2 }
 0x147   :  { %v572_v56 = vpop.f32.mrf.mxu0 }
 0x148   :  { %v575_v58 = vpop.f32.mrf.mxu1 }
 0x14d   :  { %v505_v42 = vpop.f32.mrf.mxu3 }
 0x158   :  { %v578_v62 = vpop.f32.mrf.mxu1 }
 0x15c   :  { %v508_v43 = vpop.f32.mrf.mxu3 }
 0x160   :  { %v581_v4 = vpop.f32.mrf.mxu1 }
 0x164   :  { %v511_v44 = vpop.f32.mrf.mxu3 }
 0x16c   :  { %v531_v47 = vpop.f32.mrf.mxu3 }
 0x16d   :  { %v532_v48 = vadd.f32 %v531_v47, %v496_v46 }
 0x16f   :  { %v567_v49 = vadd.f32 %v566_v45, %v532_v48 }
 0x171   :  { %584 = vst [vmem:[%s1114_s3] sm:$0xff] %v567_v49 }
 0x174   :  { %v534_v51 = vpop.f32.mrf.mxu3 }
 0x175   :  { %v535_v52 = vadd.f32 %v534_v51, %v499_v50 }
 0x177   :  { %v570_v53 = vadd.f32 %v569_v31, %v535_v52 }
 0x179   :  { %585 = vst [vmem:[%s1114_s3 + $0x8] sm:$0xff] %v570_v53 }
 0x17c   :  { %v537_v54 = vpop.f32.mrf.mxu3 }
 0x17d   :  { %v538_v55 = vadd.f32 %v537_v54, %v502_v41 }
 0x17f   :  { %v573_v57 = vadd.f32 %v572_v56, %v538_v55 }
 0x181   :  { %586 = vst [vmem:[%s1114_s3 + $0x10] sm:$0xff] %v573_v57 }
 0x184   :  { %v540_v59 = vpop.f32.mrf.mxu3 }
 0x185   :  { %v541_v60 = vadd.f32 %v540_v59, %v505_v42 }
 0x187   :  { %v576_v61 = vadd.f32 %v575_v58, %v541_v60 }
 0x189   :  { %587 = vst [vmem:[%s1114_s3 + $0x18] sm:$0xff] %v576_v61 }
 0x18c   :  { %v543_v63 = vpop.f32.mrf.mxu3 }
 0x18d   :  { %v544_v0 = vadd.f32 %v543_v63, %v508_v43 }
 0x18f   :  { %v579_v1 = vadd.f32 %v578_v62, %v544_v0 }
 0x191   :  { %588 = vst [vmem:[%s1114_s3 + $0x20] sm:$0xff] %v579_v1 }
 0x194   :  { %v546_v2 = vpop.f32.mrf.mxu3 }
 0x195   :  { %v547_v3 = vadd.f32 %v546_v2, %v511_v44 }
 0x197   :  { %v582_v5 = vadd.f32 %v581_v4, %v547_v3 }
 0x199   :  { %589 = vst [vmem:[%s1114_s3 + $0x28] sm:$0xff] %v582_v5 }

</bundles_post_ra>
